<compile_context>
chip_gen: v7x
topology: tpu7x:2x2x1
jax: 0.10.0
libtpu: 0.0.40
codegen_flags: <defaults>
</compile_context>

<pallas_src>
import functools

import jax
import jax.numpy as jnp
from jax.experimental import pallas as pl
from jax.experimental.pallas import tpu as pltpu


def mha_kernel(x_ref, wqkv_ref, wo_ref, o_ref, acc_ref, *, head_dim):
    """One grid step = (one batch element, one head).

    x_ref:    (1, S, D)        bf16 activations (cast in wrapper)
    wqkv_ref: (1, D, 3*hd)     bf16 fused per-head [Wq|Wk|Wv], Wq pre-scaled
    wo_ref:   (1, hd, D)       bf16 per-head rows of the projection weight
    o_ref:    (1, S, D)        output (x.dtype)
    acc_ref:  (S, D) f32       projection accumulator across the head axis
    """
    h = pl.program_id(1)

    @pl.when(h == 0)
    def _init():
        acc_ref[...] = jnp.zeros_like(acc_ref)

    x = x_ref[0]                                                      # (S, D) bf16
    # Fused per-head QKV projection: one MXU dot, N = 3*hd.
    qkv = jnp.dot(x, wqkv_ref[0], preferred_element_type=jnp.float32)  # (S, 3*hd) f32
    q = qkv[:, :head_dim].astype(jnp.bfloat16)          # scale already folded into Wq
    k = qkv[:, head_dim:2 * head_dim].astype(jnp.bfloat16)
    v = qkv[:, 2 * head_dim:].astype(jnp.bfloat16)

    # scores = q @ k^T via contracting-dim dot_general (no materialized transpose).
    s = jax.lax.dot_general(q, k, (((1,), (1,)), ((), ())),
                            preferred_element_type=jnp.float32)        # (S, S) f32

    # Softmax in f32; denominator reciprocal on the EUP (approx) slot.
    s = s - jnp.max(s, axis=-1, keepdims=True)
    p = jnp.exp(s)
    p = p * pl.reciprocal(jnp.sum(p, axis=-1, keepdims=True), approx=True)

    ctx = jnp.dot(p.astype(jnp.bfloat16), v,
                  preferred_element_type=jnp.float32)                  # (S, hd) f32

    # Per-head slice of the output projection, accumulated over heads.
    acc_ref[...] += jnp.dot(ctx.astype(jnp.bfloat16), wo_ref[0],
                            preferred_element_type=jnp.float32)        # (S, D) f32

    # TODO(synk): attn_dropout is identity (inference / eval mode); no RNG dropout.
    @pl.when(h == pl.num_programs(1) - 1)
    def _store():
        o_ref[0] = acc_ref[...].astype(o_ref.dtype)


def _vmem_limit_bytes():
    # Leave headroom for compiler scratch / double buffers; never exceed ~100 MiB.
    try:
        cap = pltpu.get_tpu_info().vmem_capacity_bytes
    except Exception:
        cap = 64 * 1024 * 1024
    return min(int(cap) * 3 // 4, 100 * 1024 * 1024)


def multi_head_attention_block(x, wqkv, wproj, *, n_heads):
    """x: (B, S, D). wqkv: (3D, D), wproj: (D, D) in torch Linear (out, in) layout."""
    B, S, D = x.shape
    assert D % n_heads == 0, "latent_dim must be divisible by n_heads"
    hd = D // n_heads
    H = n_heads

    # --- one-time layout plumbing OUTSIDE the kernel (plain XLA ops) ------------
    # Activations to bf16 (halves per-step HBM->VMEM bytes; kernel computes bf16).
    x_bf16 = x.astype(jnp.bfloat16)

    # Fused per-head QKV weight: (D, 3D) -> (D, 3, H, hd) -> (H, D, 3*hd), with the
    # softmax scale 1/sqrt(hd) folded into the Wq columns, then cast to bf16.
    wqkv_t = wqkv.T.reshape(D, 3, H, hd)
    wqkv_t = wqkv_t.at[:, 0].multiply(1.0 / jnp.sqrt(jnp.float32(hd)))
    w_qkv_heads = jnp.transpose(wqkv_t, (2, 0, 1, 3)).reshape(H, D, 3 * hd)
    w_qkv_heads = w_qkv_heads.astype(jnp.bfloat16)

    # Per-head rows of the output projection: wproj.T -> (H, hd, D) bf16.
    w_o_heads = wproj.T.reshape(H, hd, D).astype(jnp.bfloat16)

    kernel = functools.partial(mha_kernel, head_dim=hd)

    cost = pl.CostEstimate(
        flops=int(8 * B * S * D * D + 4 * B * S * S * D),
        transcendentals=int(B * H * S * S),
        bytes_accessed=int(B * S * D * 2 + 4 * D * D * 2
                           + B * S * D * x.dtype.itemsize),
    )

    return pl.pallas_call(
        kernel,
        out_shape=jax.ShapeDtypeStruct((B, S, D), x.dtype),
        grid_spec=pltpu.PrefetchScalarGridSpec(
            num_scalar_prefetch=0,
            grid=(B, H),
            in_specs=[
                pl.BlockSpec((1, S, D), lambda b, h: (b, 0, 0)),        # x (bf16)
                pl.BlockSpec((1, D, 3 * hd), lambda b, h: (h, 0, 0)),   # fused Wqkv[h]
                pl.BlockSpec((1, hd, D), lambda b, h: (h, 0, 0)),       # Wo[h]
            ],
            out_specs=pl.BlockSpec((1, S, D), lambda b, h: (b, 0, 0)),
            scratch_shapes=[pltpu.VMEM((S, D), jnp.float32)],           # head accumulator
        ),
        compiler_params=pltpu.CompilerParams(
            # batch steps are independent; head axis accumulates into one output block
            dimension_semantics=("parallel", "arbitrary"),
            vmem_limit_bytes=_vmem_limit_bytes(),
        ),
        cost_estimate=cost,
    )(x_bf16, w_qkv_heads, w_o_heads)


def reference_jax(x, wqkv, wproj, *, n_heads):
    """Pure-JAX f32 reference mirroring the PyTorch forward (eval mode)."""
    B, S, D = x.shape
    hd = D // n_heads
    qkv = x @ wqkv.T                                                     # (B, S, 3D)
    qkv = qkv.reshape(B, S, 3, n_heads, hd).transpose(2, 3, 0, 1, 4)
    q, k, v = qkv[0], qkv[1], qkv[2]                                     # (H, B, S, hd)
    att = (q @ jnp.swapaxes(k, -1, -2)) / jnp.sqrt(jnp.float32(hd))
    att = jax.nn.softmax(att, axis=-1)
    att = att @ v                                                        # (H, B, S, hd)
    att = att.transpose(1, 2, 0, 3).reshape(B, S, D)
    return att @ wproj.T


if __name__ == "__main__":
    B, S, D, H = 2, 8, 32, 4
    key = jax.random.PRNGKey(0)
    kx, kqkv, kproj = jax.random.split(key, 3)

    x = jax.random.normal(kx, (B, S, D), dtype=jnp.float32)
    wqkv = 0.1 * jax.random.normal(kqkv, (3 * D, D), dtype=jnp.float32)  # torch (out, in)
    wproj = 0.1 * jax.random.normal(kproj, (D, D), dtype=jnp.float32)

    out = multi_head_attention_block(x, wqkv, wproj, n_heads=H)
    out = jax.block_until_ready(out)

    ref = reference_jax(x, wqkv, wproj, n_heads=H)
    assert out.shape == (B, S, D)
    # bf16 MXU operands + approx softmax reciprocal => small deviation vs f32 ref.
    max_diff = jnp.max(jnp.abs(out - ref))
    assert jnp.allclose(out, ref, atol=2e-2, rtol=2e-2), (
        f"mismatch vs JAX reference, max abs diff {max_diff}")

    print("KERNEL_OK")
</pallas_src>

<mosaic_0001>
module attributes {stable_mosaic.version = 11 : i64} {
  func.func @mha_kernel(%arg0: i32, %arg1: i32, %arg2: memref<1x8x32xbf16, #tpu.memory_space<vmem>>, %arg3: memref<1x32x24xbf16, #tpu.memory_space<vmem>>, %arg4: memref<1x8x32xbf16, #tpu.memory_space<vmem>>, %arg5: memref<1x8x32xf32, #tpu.memory_space<vmem>>, %arg6: memref<8x32xf32, #tpu.memory_space<vmem>>) attributes {dimension_semantics = [#tpu.dimension_semantics<parallel>, #tpu.dimension_semantics<arbitrary>], iteration_bounds = array<i64: 2, 4>, scalar_prefetch = 0 : i64, scratch_operands = 1 : i64, tpu.core_type = #tpu.core_type<tc>, window_params = [{transform_indices = @transform_0, window_bounds = array<i64: 1, 8, 32>}, {transform_indices = @transform_1, window_bounds = array<i64: 1, 32, 24>}, {transform_indices = @transform_2, window_bounds = array<i64: 1, 8, 32>}, {transform_indices = @transform_3, window_bounds = array<i64: 1, 8, 32>}]} {
    %c0_i32 = arith.constant 0 : i32
    %0 = arith.cmpi eq, %arg1, %c0_i32 : i32
    %1 = arith.extui %0 : i1 to i32
    %c0_i32_0 = arith.constant 0 : i32
    %2 = arith.cmpi ne, %1, %c0_i32_0 : i32
    scf.if %2 {
      %cst_19 = arith.constant 0.000000e+00 : f32
      %37 = vector.broadcast %cst_19 : f32 to vector<8x32xf32>
      %c0_20 = arith.constant 0 : index
      %c0_21 = arith.constant 0 : index
      %38 = vector.load %arg6[%c0_20, %c0_21] : memref<8x32xf32, #tpu.memory_space<vmem>>, vector<8x32xf32>
      tpu.vector_store %arg6[%c0_20, %c0_21], %37 {strides = array<i32>} : memref<8x32xf32, #tpu.memory_space<vmem>>, vector<8x32xf32>,
    } else {
    }
    %c0 = arith.constant 0 : index
    %c0_1 = arith.constant 0 : index
    %c0_2 = arith.constant 0 : index
    %3 = vector.load %arg2[%c0, %c0_1, %c0_2] : memref<1x8x32xbf16, #tpu.memory_space<vmem>>, vector<1x8x32xbf16>
    %4 = vector.shape_cast %3 : vector<1x8x32xbf16> to vector<8x32xbf16>
    %c0_3 = arith.constant 0 : index
    %c0_4 = arith.constant 0 : index
    %c0_5 = arith.constant 0 : index
    %5 = vector.load %arg3[%c0_3, %c0_4, %c0_5] : memref<1x32x24xbf16, #tpu.memory_space<vmem>>, vector<1x32x24xbf16>
    %6 = vector.shape_cast %5 : vector<1x32x24xbf16> to vector<32x24xbf16>
    %cst = arith.constant dense<0.000000e+00> : vector<8x24xf32>
    %7 = tpu.matmul %4, %6, %cst {dimension_numbers = #tpu.dot_dimension_numbers<[1], [0], [0], [1], [0, 0, 1, 1], [], []>} : vector<8x32xbf16>, vector<32x24xbf16>, vector<8x24xf32> -> vector<8x24xf32>
    %8 = vector.extract_strided_slice %7 {offsets = [0, 0], sizes = [8, 8], strides = [1, 1]} : vector<8x24xf32> to vector<8x8xf32>
    %9 = arith.truncf %8 : vector<8x8xf32> to vector<8x8xbf16>
    %10 = vector.extract_strided_slice %7 {offsets = [0, 8], sizes = [8, 8], strides = [1, 1]} : vector<8x24xf32> to vector<8x8xf32>
    %11 = arith.truncf %10 : vector<8x8xf32> to vector<8x8xbf16>
    %12 = vector.extract_strided_slice %7 {offsets = [0, 16], sizes = [8, 8], strides = [1, 1]} : vector<8x24xf32> to vector<8x8xf32>
    %13 = arith.truncf %12 : vector<8x8xf32> to vector<8x8xbf16>
    %cst_6 = arith.constant dense<0.000000e+00> : vector<8x8xf32>
    %14 = tpu.matmul %9, %11, %cst_6 {dimension_numbers = #tpu.dot_dimension_numbers<[1], [1], [0], [0], [0, 0, 1, 0], [], []>} : vector<8x8xbf16>, vector<8x8xbf16>, vector<8x8xf32> -> vector<8x8xf32>
    %cst_7 = arith.constant dense<0xFF800000> : vector<8xf32>
    %15 = vector.multi_reduction <maximumf>, %14, %cst_7 [1] : vector<8x8xf32> to vector<8xf32>
    %16 = vector.shape_cast %15 : vector<8xf32> to vector<8x1xf32>
    %17 = vector.broadcast %16 : vector<8x1xf32> to vector<8x8xf32>
    %18 = arith.subf %14, %17 : vector<8x8xf32>
    %19 = math.exp %18 : vector<8x8xf32>
    %cst_8 = arith.constant dense<0.000000e+00> : vector<8xf32>
    %20 = vector.multi_reduction <add>, %19, %cst_8 [1] : vector<8x8xf32> to vector<8xf32>
    %21 = vector.shape_cast %20 : vector<8xf32> to vector<8x1xf32>
    %22 = tpu.reciprocal %21 {approx = true} : vector<8x1xf32> -> vector<8x1xf32>
    %23 = vector.broadcast %22 : vector<8x1xf32> to vector<8x8xf32>
    %24 = arith.mulf %19, %23 : vector<8x8xf32>
    %25 = arith.truncf %24 : vector<8x8xf32> to vector<8x8xbf16>
    %cst_9 = arith.constant dense<0.000000e+00> : vector<8x8xf32>
    %26 = tpu.matmul %25, %13, %cst_9 {dimension_numbers = #tpu.dot_dimension_numbers<[1], [0], [0], [1], [0, 0, 1, 1], [], []>} : vector<8x8xbf16>, vector<8x8xbf16>, vector<8x8xf32> -> vector<8x8xf32>
    %c0_10 = arith.constant 0 : index
    %c0_11 = arith.constant 0 : index
    %27 = vector.load %arg6[%c0_10, %c0_11] : memref<8x32xf32, #tpu.memory_space<vmem>>, vector<8x32xf32>
    %28 = arith.truncf %26 : vector<8x8xf32> to vector<8x8xbf16>
    %c0_12 = arith.constant 0 : index
    %c0_13 = arith.constant 0 : index
    %c0_14 = arith.constant 0 : index
    %29 = vector.load %arg4[%c0_12, %c0_13, %c0_14] : memref<1x8x32xbf16, #tpu.memory_space<vmem>>, vector<1x8x32xbf16>
    %30 = vector.shape_cast %29 : vector<1x8x32xbf16> to vector<8x32xbf16>
    %cst_15 = arith.constant dense<0.000000e+00> : vector<8x32xf32>
    %31 = tpu.matmul %28, %30, %cst_15 {dimension_numbers = #tpu.dot_dimension_numbers<[1], [0], [0], [1], [0, 0, 1, 1], [], []>} : vector<8x8xbf16>, vector<8x32xbf16>, vector<8x32xf32> -> vector<8x32xf32>
    %32 = arith.addf %27, %31 : vector<8x32xf32>
    %c0_16 = arith.constant 0 : index
    %c0_17 = arith.constant 0 : index
    %33 = vector.load %arg6[%c0_16, %c0_17] : memref<8x32xf32, #tpu.memory_space<vmem>>, vector<8x32xf32>
    tpu.vector_store %arg6[%c0_16, %c0_17], %32 {strides = array<i32>} : memref<8x32xf32, #tpu.memory_space<vmem>>, vector<8x32xf32>,
    %c3_i32 = arith.constant 3 : i32
    %34 = arith.cmpi eq, %arg1, %c3_i32 : i32
    %35 = arith.extui %34 : i1 to i32
    %c0_i32_18 = arith.constant 0 : i32
    %36 = arith.cmpi ne, %35, %c0_i32_18 : i32
    scf.if %36 {
      %c0_19 = arith.constant 0 : index
      %c0_20 = arith.constant 0 : index
      %37 = vector.load %arg6[%c0_19, %c0_20] : memref<8x32xf32, #tpu.memory_space<vmem>>, vector<8x32xf32>
      %c0_21 = arith.constant 0 : index
      %c0_22 = arith.constant 0 : index
      %c0_23 = arith.constant 0 : index
      %38 = vector.load %arg5[%c0_21, %c0_22, %c0_23] : memref<1x8x32xf32, #tpu.memory_space<vmem>>, vector<1x8x32xf32>
      %39 = vector.shape_cast %38 : vector<1x8x32xf32> to vector<8x32xf32>
      %40 = vector.shape_cast %37 : vector<8x32xf32> to vector<1x8x32xf32>
      tpu.vector_store %arg5[%c0_21, %c0_22, %c0_23], %40 {strides = array<i32>} : memref<1x8x32xf32, #tpu.memory_space<vmem>>, vector<1x8x32xf32>,
    } else {
    }
    return
  }
  func.func @transform_0(%arg0: i32, %arg1: i32) -> (i32, i32, i32) {
    %c0_i32 = arith.constant 0 : i32
    %c0_i32_0 = arith.constant 0 : i32
    %c0_i32_1 = arith.constant 0 : i32
    return %arg0, %c0_i32, %c0_i32_0 : i32, i32, i32
  }
  func.func @transform_1(%arg0: i32, %arg1: i32) -> (i32, i32, i32) {
    %c0_i32 = arith.constant 0 : i32
    %c0_i32_0 = arith.constant 0 : i32
    %c0_i32_1 = arith.constant 0 : i32
    return %arg1, %c0_i32, %c0_i32_0 : i32, i32, i32
  }
  func.func @transform_2(%arg0: i32, %arg1: i32) -> (i32, i32, i32) {
    %c0_i32 = arith.constant 0 : i32
    %c0_i32_0 = arith.constant 0 : i32
    %c0_i32_1 = arith.constant 0 : i32
    return %arg1, %c0_i32, %c0_i32_0 : i32, i32, i32
  }
  func.func @transform_3(%arg0: i32, %arg1: i32) -> (i32, i32, i32) {
    %c0_i32 = arith.constant 0 : i32
    %c0_i32_0 = arith.constant 0 : i32
    %c0_i32_1 = arith.constant 0 : i32
    return %arg0, %c0_i32, %c0_i32_0 : i32, i32, i32
  }
}

</mosaic_0001>

<bundles_post_ra>
// kernel: tpu_custom_call.1
= control target key start
LH: loop header
LB: loop body
LE: loop exit
PB: predicated region body
PF: predicated region fallthrough
CT: control target
= control target key end

     0   :  { %8 = vsyncpa [#allocation4], 0  ;;  %s985_s0 = inlined_call_operand.vmem [shape: bf16[2,8,32], index: 0, kind: input, shape index: {}]   ;;  %s986_s1 = inlined_call_operand.vmem [shape: bf16[4,32,24], index: 1, kind: input, shape index: {}]   ;;  %s987_s2 = inlined_call_operand.vmem [shape: bf16[4,8,32], index: 2, kind: input, shape index: {}]   ;;  %s988_s3 = inlined_call_operand.hbm [shape: f32[2,8,32], index: 3, kind: output, shape index: {}]  }
   0x1   :  { %10 = vsyncpa [#allocation4 + $0x1], 0  ;;  %s822_s12 = smov 0   ;;  %s824_s13 = smov 0  }
   0x2   :  { %s826_s14 = smov 0   ;;  %s828_s15 = smov 0  }
   0x3   :  { %s830_s16 = smov 0   ;;  %s832_s17 = smov 0  }
   0x4   :  { %s834_s18 = smov 0   ;;  %s836_s19 = smov 0  }
   0x5 LB: > { %s560_s20 = sadd.s32 4294967295, %s794_s19   ;;  %s561_s21 = sadd.s32 4294967294, %s794_s19   ;;  %s794_s19 = sphi %s836_s19, %s16_s19   ;;  %s790_s18 = sphi %s834_s18, %s1004_s18   ;;  %s786_s17 = sphi %s832_s17, %s1003_s17   ;;  %s782_s16 = sphi %s830_s16, %s1002_s16   ;;  %s778_s15 = sphi %s828_s15, %s1001_s15   ;;  %s774_s14 = sphi %s826_s14, %s1000_s14   ;;  %s770_s13 = sphi %s824_s13, %s999_s13   ;;  %s766_s12 = sphi %s822_s12, %s998_s12  }
   0x6   : > { %s25_s22 = sadd.s32 1, %s786_s17  ;;  %s28_s23 = sadd.s32 1, %s790_s18 }
   0x7   : > { %p26_p0 = scmp.ge.s32.totalorder %s25_s22, 4  ;;  %p123_p1 = scmp.ne.s32.totalorder %s774_s14, %s770_s13 }
   0x8   : > { %p124_p2 = scmp.eq.s32.totalorder %s560_s20, 7  ;;  %p129_p4 = scmp.ne.s32.totalorder %s770_s13, %s766_s12 }
   0x9   : > { %s1006_s22 = smov (%p26_p0, %s25_s22), 0  ;;  %s1008_s23 = smov (!%p26_p0, %s28_s23), %s790_s18 }
   0xa   : > { %991 = sst [smem:[#allocation6_spill]] %s1006_s22  ;;  %p871_p3 = por %p124_p2, %p123_p1 }
   0xb   : > { %p30_p5 = scmp.ge.s32.totalorder %s1008_s23, 2  ;;  %p130_p6 = scmp.eq.s32.totalorder %s561_s21, 7 }
   0xc   : > { %p564_p7 = scmp.ge.s32.totalorder %s794_s19, 1  ;;  %p170_p8 = scmp.lt.s32.totalorder %s794_s19, 9 }
   0xd   : > { %s1010_s23 = smov (%p30_p5, %s1008_s23), 0  ;;  %p881_p9 = por %p130_p6, %p129_p4 }
   0xe   : > { %993 = sst [smem:[#allocation7_spill]] %s1010_s23  ;;  %p171_p10 = pnand %p564_p7, %p170_p8 }
   0xf   : > { %s110_s26 = ssub.s32 %s790_s18, %s1010_s23  ;;  %s113_s27 = sadd.s32 1, %s774_s14 }
  0x10   : > { %p111_p11 = scmp.eq.s32.totalorder %s110_s26, 0  ;;  %174 = sbr.rel (%p171_p10) target bundleno = 1368 (0x558), region = 32 }
  0x11   : > { %s990_s29 = sand.u32 (!%p171_p10), 1, %s770_s13   ;;  %p202_p12 = scmp.lt.s32.totalorder (!%p171_p10), %s782_s16, 1 }
  0x12   : > { %s889_s28 = scalar_select %p111_p11, %s774_s14, %s113_s27  }
  0x13   : > { %s895_s30 = sshll.u32 (!%p171_p10), %s990_s29, 3  ;;  %p206_p13 = scmp.lt.s32.totalorder (!%p171_p10), %s778_s15, 3 }
  0x14   : > { %s201_s22 = scalar_lea.vmem (!%p171_p10), [#allocation3], %s895_s30  ;;  %p570_p0 = scmp.ne.s32.totalorder (!%p171_p10), %s778_s15, 0 }
  0x17   : > { %s203_s4 = scalar_select %p202_p12, %s782_s16, 1 }
  0x18   : > { %s207_s5 = scalar_select %p206_p13, %s778_s15, 3 }
  0x19   : > { %s566_s6 = sshll.u32 %s203_s4, 2  ;;  %219 = sbr.rel (%p570_p0) target bundleno = 32 (0x20), region = 36  ;;  %vm220_vm0 = vcmask (!%p570_p0), 261120   ;;  %v796_v0 = vmov (!%p570_p0), 0.0  }
  0x1a   : > { %s205_s9 = scalar_lea.vmem %s985_s0, %s566_s6  ;;  %s582_s10 = sshll.u32 %s207_s5, 4  ;;  %221 = vst.msk [vmem:[#allocation2] sm:$0xff] (!%p570_p0), %vm220_vm0, %v796_v0 }
  0x1b   : > { %s210_s21 = scalar_lea.vmem %s986_s1, %s582_s10  ;;  %s569_s26 = sshll.u32 %s207_s5, 2 }
  0x1c   : > { %s909_s29 = scalar_lea.vmem %s987_s2, %s569_s26 }
  0x20 PF: > { %v694_v1 = vld [vmem:[%s210_s21] sm:$0xff]   ;;  %v797_v2 = vmov 0.0   ;;  %v695_v3 = vld [vmem:[%s210_s21 + $0x8] sm:$0xff]   ;;  %vm798_vm1 = vmmov 0   ;;  %vm239_vm2 = vcmask 261120   ;;  %s799_s23 = smov 120  }
  0x21   : > { %592 = vmatprep.subr.bf16.mxu0 %v797_v2  ;;  %600 = vmatprep.subr.bf16.mxu1 %v797_v2  ;;  %v222_v4 = vld [vmem:[%s205_s9] sm:$0xf]  ;;  %vm287_vm3 = vcmask 64512   ;;  %s800_s4 = smov 112   ;;  %vm351_vm4 = vcmask 1043456   ;;  %p577_p1 = scmp.ne.s32.totalorder %s778_s15, 3 }
  0x22   : > { %593 = vmatpush3.bf16.msra.mxu0 %v694_v1  ;;  %596 = vmatprep.mubr.msk.bf16.mxu0 %vm798_vm1, %v797_v2  ;;  %v397_v22 = vld [vmem:[%s909_s29] sm:$0xf] }
  0x23   : > { %594 = vmatprep.subr.bf16.mxu0 %v797_v2  ;;  %602 = vmatprep.mubr.msk.bf16.mxu1 %vm798_vm1, %v797_v2  ;;  %v402_v23 = vsel %vm351_vm4, %v397_v22, 0  ;;  %v395_v35 = vld [vmem:[#allocation2] sm:$0xff] }
  0x26   : > { %595 = vmatpush3.bf16.msra.mxu0 %v695_v3 }
  0x27   : > { %606 = vmatprep.subr.bf16.mxu0 %v797_v2 }
  0x29   : > { %597 = vmatmul.mubr.msk.bf16.vlgmr.msra.gmra.mrb[0].mxu0 %vm239_vm2, %v222_v4 }
  0x2a   : > { %608 = vmatprep.mubr.msk.bf16.mxu0 %vm798_vm1, %v797_v2 }
  0xfc   : > { %v277_v5 = vpop.f32.mrb[0].mxu0 }
  0xfd   : > { %v283_v6 = vpack.c.bf16 %v277_v5, %v277_v5  ;;  %v598_v7 = vpop.f32.mrb[1].mxu0 }
  0xfe   : > { %v280_v8 = vpop.f32.mrb[2].mxu0 }
  0xff   : > { %285 = vrot.lane.b32.xlu0 %v283_v6, %s799_s23  ;;  %v599_v9 = vpop.f32.mrb[3].mxu0 }
 0x171   : > { %v286_v10 = vpop.permute.xlu0 %285 }
 0x172   : > { %v292_v11 = vsel %vm287_vm3, %v286_v10, 0 }
 0x173   : > { %601 = vmatpush3.bf16.xpose.msra.mxu1 %v292_v11 }
 0x174   : > { %612 = vmatprep.subr.bf16.mxu1 %v797_v2 }
 0x17a   : > { %603 = vmatmul.mubr.msk.bf16.vlgmr.msra.gmra.mrb[0].mxu1 %vm287_vm3, %v283_v6 }
 0x17b   : > { %614 = vmatprep.mubr.msk.bf16.mxu1 %vm798_vm1, %v797_v2  ;;  %613 = vmatpush3.bf16.msra.mxu1 %v402_v23 }
 0x24d   : > { %v328_v12 = vpop.f32.mrb[0].mxu1 }
 0x24e   : > { %v604_v13 = vpop.f32.mrb[1].mxu1  ;;  %v334_v14 = vsel %vm287_vm3, %v328_v12, -inf }
 0x24f   : > { %335 = vmax.xlane.f32.xlu0 %v334_v14  ;;  %v331_v15 = vpop.f32.mrb[2].mxu1 }
 0x250   : > { %v605_v16 = vpop.f32.mrb[3].mxu1 }
 0x2dc   : > { %v336_v17 = vpop.xlane.xlu0 %335 }
 0x2dd   : > { %v337_v18 = vsub.f32 %v328_v12, %v336_v17 }
 0x2df   : > { %v338_v19 = vmul.f32 1.442695, %v337_v18 }
 0x2e1   : > { %696 = vpow2.f32 %v338_v19 }
 0x2eb   : > { %v697_v20 = vpop.eup %696 }
 0x2ec   : > { %v340_v21 = vsel %vm287_vm3, %v697_v20, 0.0 }
 0x2ed   : > { %341 = vadd.xlane.f32.xlu1 %v340_v21 }
 0x2fe   : > { %346 = vrot.lane.b32.xlu1 %v283_v6, %s800_s4 }
 0x37a   : > { %v342_v24 = vpop.xlane.xlu1 %341 }
 0x37b   : > { %698 = vrcp.f32 %v342_v24 }
 0x37e   : > { %v347_v25 = vpop.permute.xlu1 %346 }
 0x37f   : > { %v353_v26 = vsel %vm351_vm4, %v347_v25, 0 }
 0x380   : > { %607 = vmatpush3.bf16.msra.mxu0 %v353_v26 }
 0x385   : > { %v699_v27 = vpop.eup %698 }
 0x386   : > { %v344_v28 = vmul.f32 %v699_v27, %v697_v20 }
 0x388   : > { %v345_v29 = vpack.c.bf16 %v344_v28, %v344_v28 }
 0x38a   : > { %609 = vmatmul.mubr.msk.bf16.vlgmr.msra.gmra.mrb[4].mxu0 %vm287_vm3, %v345_v29 }
 0x45d   : > { %v389_v30 = vpop.f32.mrb[4].mxu0 }
 0x45e   : > { %v396_v31 = vpack.c.bf16 %v389_v30, %v389_v30  ;;  %v610_v32 = vpop.f32.mrb[5].mxu0 }
 0x45f   : > { %v392_v33 = vpop.f32.mrb[6].mxu0 }
 0x460   : > { %v611_v34 = vpop.f32.mrb[7].mxu0  ;;  %615 = vmatmul.mubr.msk.bf16.vlgmr.msra.gmra.mrb[4].mxu1 %vm287_vm3, %v396_v31 }
 0x530   : > { %449 = sbr.rel (%p577_p1) target bundleno = 1343 (0x53f), region = 40 }
 0x533   : > { %v438_v36 = vpop.f32.mrb[4].mxu1 }
 0x534   : > { %v444_v37 = vadd.f32 %v438_v36, %v395_v35  ;;  %v616_v38 = vpop.f32.mrb[5].mxu1 }
 0x535   : > { %v441_v39 = vpop.f32.mrb[6].mxu1 }
 0x536   : > { %445 = vst.msk [vmem:[#allocation2] sm:$0xff] %vm239_vm2, %v444_v37  ;;  %v617_v40 = vpop.f32.mrb[7].mxu1 }
 0x53d   : > { %v450_v41 = vld [vmem:[#allocation2] sm:$0xff] }
 0x53e   : > { %451 = vst.msk [vmem:[%s201_s22] sm:$0xff] %vm239_vm2, %v450_v41 }
 0x53f PF: > { %s579_s29 = sshll.u32 %s782_s16, 7  ;;  %s466_s8 = sshll.u32 %s201_s22, 4  ;;  %s467_s8 = int_to_ptr.vmem [resolvable:$true] %s466_s8 }
 0x540   : > { %s934_s7 = scalar_lea.hbm %s988_s3, %s579_s29  ;;  %s995_s15 = sand.u32 1, %s770_s13  }
 0x541   : > { %s453_s9 = scalar_lea.sflag [#allocation4], %s995_s15  ;;  %s700_s10 = scalar_lea.vmem %s467_s8, 128 }
 0x542   : > { %p701_p2 = scmp.ne.s32.totalorder %s467_s8, %s700_s10  ;;  %s801_s11 = smov [#allocation3]  }
 0x543   : > { %s704_s20 = sshll.u32 %s801_s11, 4  ;;  %s705_s20 = int_to_ptr.vmem [resolvable:$false] %s704_s20 }
 0x544   : > { %p702_p4 = pnand %p701_p2, %p871_p3  ;;  %s706_s21 = scalar_lea.vmem %s705_s20, 256 }
 0x545   : > { %p707_p6 = scmp.lt.s32.totalorder %s467_s8, %s705_s20  ;;  %p708_p7 = scmp.lt.s32.totalorder %s706_s21, %s700_s10 }
 0x546   : > { %p703_p5 = pneg %p702_p4 }
 0x547   : > { %p709_p8 = por %p708_p7, %p707_p6 }
 0x549   : > { %p710_p10 = pnand %p709_p8, %p703_p5 }
 0x54b   : > { %713 = shalt.err (!%p710_p10)
}
 0x54c   : > { %s714_s16 = scalar_lea.hbm %s934_s7, 128  ;;  %s718_s26 = scalar_lea.hbm %s988_s3, 256 }
 0x54d   : > { %p715_p11 = scmp.ne.s32.totalorder %s934_s7, %s714_s16  ;;  %p719_p0 = scmp.lt.u32.totalorder %s934_s7, %s988_s3 }
 0x54e   : > { %p720_p1 = scmp.lt.u32.totalorder %s718_s26, %s714_s16  ;;  %p722_p4 = scmp.lt.u32.totalorder %s714_s16, %s934_s7 }
 0x54f   : > { %p716_p12 = pnand %p715_p11, %p871_p3 }
 0x550   : > { %p721_p2 = por %p720_p1, %p719_p0 }
 0x551   : > { %p717_p13 = pneg %p716_p12 }
 0x552   : > { %p723_p5 = por %p722_p4, %p721_p2 }
 0x554   : > { %p724_p6 = pnand %p723_p5, %p717_p13 }
 0x556   : > { %727 = shalt.err (!%p724_p6)
}
 0x557   : > { %618 = dma.vmem_to_hbm [thread:$0]  (%p871_p3), %s467_s8, 128, %s934_s7, %s453_s9  }
 0x558 PF: > { %p624_p7 = scmp.ge.s32.totalorder %s794_s19, 2  ;;  %s478_s4 = sand.u32 1, %s766_s12  }
 0x559   : > { %s479_s29 = scalar_lea.sflag [#allocation4], %s478_s4 }
 0x55a   : > { %p621_p8 = pnand %p624_p7, %p881_p9 }
 0x55c   : > { %761 = dma.done.wait (!%p621_p8), %s479_s29, 128  }
 0x55d   : > { %763 = vsyncadd (!%p621_p8), %s479_s29, 4294967168  ;;  %s16_s19 = sadd.s32 1, %s794_s19   ;;  %s996_s24 = sld [smem:[#allocation6_spill]] }
 0x55e   : > { %p13_p10 = scmp.ge.s32.totalorder %s16_s19, 10   ;;  %s997_s5 = sld [smem:[#allocation7_spill]] }
 0x55f   : > { %s998_s12 = smov %s770_s13  ;;  %s999_s13 = smov %s774_s14 }
 0x560   : > { %s1000_s14 = smov %s889_s28  ;;  %s1001_s15 = smov %s786_s17 }
 0x561   : > { %s1002_s16 = smov %s790_s18  ;;  %15 = sbr.rel (!%p13_p10) target bundleno = 5 (0x5), region = 81 }
 0x563   : > { %s1003_s17 = smov %s996_s24 }
 0x564   : > { %s1004_s18 = smov %s997_s5 }
 0x568   :  { %484 = vsyncpa [#allocation4], 1 }
 0x569   :  { %486 = vsyncpa [#allocation4 + $0x1], 1 }

</bundles_post_ra>
